<compile_context>
chip_gen: v7x
topology: tpu7x:2x2x1
jax: 0.10.0
libtpu: 0.0.40
codegen_flags: <defaults>
</compile_context>

<pallas_src>
import math
import functools

import numpy as np
import jax
import jax.numpy as jnp
from jax.experimental import pallas as pl
from jax.experimental.pallas import tpu as pltpu


# ----------------------------------------------------------------------------
# Tiled Pallas matmul for the linear projections (y = x @ w, f32 accumulation)
# ----------------------------------------------------------------------------
def _matmul_kernel(x_ref, w_ref, o_ref, acc_ref):
    @pl.when(pl.program_id(2) == 0)
    def _init():
        acc_ref[...] = jnp.zeros_like(acc_ref)

    acc_ref[...] += jnp.dot(x_ref[...], w_ref[...],
                            preferred_element_type=jnp.float32)

    @pl.when(pl.program_id(2) == pl.num_programs(2) - 1)
    def _store():
        o_ref[...] = acc_ref[...].astype(o_ref.dtype)


def _fit_tile(dim, cap, granule):
    """Largest tile <= cap that divides `dim` and is a multiple of `granule`.
    Falls back to the full extent, which is always a legal block shape."""
    if dim <= cap:
        return dim
    t = (cap // granule) * granule
    while t >= granule:
        if dim % t == 0:
            return t
        t -= granule
    return dim


def pallas_matmul(x, w, *, out_dtype=None, tm=256, tk=512, tn=256):
    """y = x @ w with a (M//tm, N//tn, K//tk) grid; K innermost ('arbitrary')
    so the f32 accumulator stays resident in VMEM.  Feed bf16 operands."""
    M, K = x.shape
    K2, N = w.shape
    assert K == K2
    out_dtype = out_dtype or x.dtype
    tm = _fit_tile(M, tm, 8)
    tk = _fit_tile(K, tk, 128)
    tn = _fit_tile(N, tn, 128)
    grid = (M // tm, N // tn, K // tk)
    return pl.pallas_call(
        _matmul_kernel,
        out_shape=jax.ShapeDtypeStruct((M, N), out_dtype),
        grid=grid,
        in_specs=[
            pl.BlockSpec((tm, tk), lambda i, j, kk: (i, kk)),
            pl.BlockSpec((tk, tn), lambda i, j, kk: (kk, j)),
        ],
        out_specs=pl.BlockSpec((tm, tn), lambda i, j, kk: (i, j)),
        scratch_shapes=[pltpu.VMEM((tm, tn), jnp.float32)],
        compiler_params=pltpu.CompilerParams(
            dimension_semantics=("parallel", "parallel", "arbitrary")),
    )(x, w)


# ----------------------------------------------------------------------------
# Heavy-hitter-ideal attention kernel: grid = (batch, head, q_tile)
# ----------------------------------------------------------------------------
def _hh_attn_kernel(q_ref, k_ref, v_ref, o_ref, lstar_ref, kcol_ref, *,
                    heavy_budget):
    q = q_ref[0, 0]            # (TQ, D)  bf16, pre-scaled by 1/sqrt(D)
    kmat = k_ref[0, 0]         # (S,  D)  bf16 (resident across q tiles)
    v = v_ref[0, 0]            # (S,  D)  bf16

    TQ, D = q.shape
    S = kmat.shape[0]
    kb = heavy_budget
    f32_min = jnp.float32(jnp.finfo(jnp.float32).min)

    # scores = q @ k^T (1/sqrt(D) already folded into q); bf16 operands,
    # f32 MXU accumulation, contraction on the last dims (no K transpose).
    scores = jax.lax.dot_general(
        q, kmat, (((1,), (1,)), ((), ())),
        preferred_element_type=jnp.float32)                  # (TQ, S) f32

    # Causal mask built in-kernel (HF semantics: masked entries == finfo.min).
    # TODO(synk): the S == 1 decode path of the PyTorch module (fill value =
    # min(attention_mask) == 0) is not reproduced.
    row0 = pl.program_id(2) * TQ
    row_ids = row0 + jax.lax.broadcasted_iota(jnp.int32, (TQ, S), 0)
    col_ids = jax.lax.broadcasted_iota(jnp.int32, (TQ, S), 1)
    causal = col_ids <= row_ids
    scores = jnp.where(causal, scores, f32_min)

    # ---- exact per-row top-kb selection ------------------------------------
    # Softmax is monotone, so top-k of softmax(row) == top-k of the raw scores.
    # Map f32 -> order-preserving int32 key, then:
    #   (1) 16-step binary search on the *upper 16 key bits* for the bucket of
    #       the kb-th largest key,
    #   (2) only if some selection row's bucket is over-full, a 16-step
    #       refinement on the lower 16 bits (-> exact kb-th key),
    #   (3) only if some row still has more exact-key ties than budget left, a
    #       log2(S)-step column tie-break (lowest column wins).
    # Steps (2)/(3) are gated with pl.when, so the common case pays ~16
    # compare+reduce (TQ,S) passes instead of 32 + log2(S); the result is
    # exact in every branch.
    bits = pltpu.bitcast(scores, jnp.int32)
    keys = jnp.where(bits < 0, bits ^ jnp.int32(0x7FFFFFFF), bits)
    upper = keys >> 16                                     # in [-2^15, 2^15)

    cnt_nonneg = jnp.sum((upper >= 0).astype(jnp.int32), axis=-1, keepdims=True)
    u_pfx = jnp.where(cnt_nonneg >= kb, jnp.int32(0), jnp.int32(-(1 << 15)))

    def upper_bit_body(_, carry):
        pfx, bit = carry
        cand = pfx + bit
        cnt = jnp.sum((upper >= cand).astype(jnp.int32), axis=-1, keepdims=True)
        return jnp.where(cnt >= kb, cand, pfx), bit >> 1

    u_star, _ = jax.lax.fori_loop(0, 15, upper_bit_body,
                                  (u_pfx, jnp.int32(1 << 14)), unroll=True)

    in_bucket = upper == u_star
    cnt_gt_u = jnp.sum((upper > u_star).astype(jnp.int32),
                       axis=-1, keepdims=True)
    cnt_ge_u = cnt_gt_u + jnp.sum(in_bucket.astype(jnp.int32),
                                  axis=-1, keepdims=True)

    # Rows <= kb use the plain causal mask; don't let them trigger the
    # expensive refinement paths.
    row_is_topk = (row0 + jax.lax.broadcasted_iota(jnp.int32, (TQ, 1), 0)) > kb

    lstar_ref[...] = jnp.zeros((TQ, 1), jnp.int32)         # cheap-path default

    @pl.when(jnp.max(jnp.where(row_is_topk, cnt_ge_u, 0)) > kb)
    def _refine_lower16():
        low = keys & jnp.int32(0xFFFF)                     # in [0, 2^16)
        rem_u = kb - cnt_gt_u                              # >= 1 by construction

        def low_bit_body(_, carry):
            pfx, bit = carry
            cand = pfx + bit
            cnt = jnp.sum((in_bucket & (low >= cand)).astype(jnp.int32),
                          axis=-1, keepdims=True)
            return jnp.where(cnt >= rem_u, cand, pfx), bit >> 1

        l_star, _ = jax.lax.fori_loop(
            0, 16, low_bit_body,
            (jnp.zeros((TQ, 1), jnp.int32), jnp.int32(1 << 15)), unroll=True)
        lstar_ref[...] = l_star

    kth_key = (u_star << 16) | lstar_ref[...]              # exact kb-th largest key
    eq = keys == kth_key
    cnt_gt = jnp.sum((keys > kth_key).astype(jnp.int32), axis=-1, keepdims=True)
    cnt_eq = jnp.sum(eq.astype(jnp.int32), axis=-1, keepdims=True)

    kcol_ref[...] = jnp.full((TQ, 1), S, jnp.int32)        # keep all ties (cheap path)

    @pl.when(jnp.max(jnp.where(row_is_topk, cnt_gt + cnt_eq, 0)) > kb)
    def _column_tie_break():
        rem = kb - cnt_gt
        m_bits = max(int(S - 1).bit_length(), 1)

        def col_bit_body(_, carry):
            u, bit = carry
            cand = u + bit
            cnt = jnp.sum((eq & (col_ids < cand)).astype(jnp.int32),
                          axis=-1, keepdims=True)
            return jnp.where(cnt < rem, cand, u), bit >> 1

        kth_col, _ = jax.lax.fori_loop(
            0, m_bits, col_bit_body,
            (jnp.zeros((TQ, 1), jnp.int32), jnp.int32(1 << (m_bits - 1))),
            unroll=True)
        kcol_ref[...] = kth_col

    topk_sel = (keys > kth_key) | (eq & (col_ids <= kcol_ref[...]))

    # Rows 0..kb use the plain causal mask (reference: tril of first kb+1 cols).
    mask_bottom = jnp.where(row_ids <= kb, causal, topk_sel)
    masked = jnp.where(mask_bottom, scores, f32_min)

    # softmax in f32; the divide goes to the EUP via approx reciprocal.
    row_max = jnp.max(masked, axis=-1, keepdims=True)
    e = jnp.exp(masked - row_max)
    denom = jnp.sum(e, axis=-1, keepdims=True)
    probs = e * pl.reciprocal(denom, approx=True)

    out = jax.lax.dot_general(
        probs.astype(v.dtype), v, (((1,), (0,)), ((), ())),
        preferred_element_type=jnp.float32)
    o_ref[...] = out.reshape(o_ref.shape).astype(o_ref.dtype)


def _pick_tq(S, D, *, budget_bytes=28 * 1024 * 1024, cap=512):
    """q-tile size from a VMEM live-set budget (v7x-safe: 64 MiB VMEM).
    Live set ~ 6 f32 (TQ,S) temporaries + double-buffered whole-S K/V (bf16).
    On v6e/v5e (128 MiB VMEM) sweeping a larger budget / cap is worthwhile."""
    kv_bytes = 2 * 2 * S * D * 2          # 2 tensors x 2 buffers x bf16
    per_row = 24 * S                      # ~6 f32 temporaries per (row, col)
    avail = budget_bytes - kv_bytes
    tq = avail // per_row if avail > 0 else 8
    tq = int(min(tq, cap, S))
    if tq >= S:
        return S
    t = max((tq // 8) * 8, 8)
    while t >= 8 and S % t != 0:
        t -= 8
    return t if (t >= 8 and S % t == 0) else S


def pallas_heavy_hitter_attention(q, k, v, heavy_budget, *, tq=None):
    B, H, S, D = q.shape
    assert heavy_budget >= 1
    if tq is None:
        tq = _pick_tq(S, D)
    assert S % tq == 0

    kernel = functools.partial(_hh_attn_kernel, heavy_budget=heavy_budget)

    # Lane-dense direct (B, S, hidden) bf16 output when head_dim is a multiple
    # of 128 (kills the XLA transpose + halves writeback bytes); otherwise
    # fall back to (B, H, S, D) so block shapes stay legal for small heads.
    direct = (D % 128 == 0)
    if direct:
        out_shape = jax.ShapeDtypeStruct((B, S, H * D), jnp.bfloat16)
        out_spec = pl.BlockSpec((1, tq, D), lambda b, h, qt: (b, qt, h))
    else:
        out_shape = jax.ShapeDtypeStruct((B, H, S, D), jnp.bfloat16)
        out_spec = pl.BlockSpec((1, 1, tq, D), lambda b, h, qt: (b, h, qt, 0))

    cost = pl.CostEstimate(
        flops=4 * B * H * S * S * D,          # QK^T and P@V
        transcendentals=B * H * S * S,        # exp
        bytes_accessed=2 * (q.size + k.size + v.size) + 2 * B * H * S * D)

    return pl.pallas_call(
        kernel,
        out_shape=out_shape,
        grid=(B, H, S // tq),
        in_specs=[
            pl.BlockSpec((1, 1, tq, D), lambda b, h, qt: (b, h, qt, 0)),  # q
            pl.BlockSpec((1, 1, S, D), lambda b, h, qt: (b, h, 0, 0)),    # k
            pl.BlockSpec((1, 1, S, D), lambda b, h, qt: (b, h, 0, 0)),    # v
        ],
        out_specs=out_spec,
        scratch_shapes=[pltpu.VMEM((tq, 1), jnp.int32),   # l_star
                        pltpu.VMEM((tq, 1), jnp.int32)],  # kth_col
        compiler_params=pltpu.CompilerParams(
            # qt is 'arbitrary' so the whole-S K/V blocks (constant index map
            # over qt) are DMA'd once per (b, h) and stay resident.
            dimension_semantics=("parallel", "parallel", "arbitrary"),
            vmem_limit_bytes=48 * 1024 * 1024,
        ),
        cost_estimate=cost,
    )(q, k, v)


# ----------------------------------------------------------------------------
# JAX glue: rotary embedding, fused projections, full forward
# ----------------------------------------------------------------------------
def rotary_cos_sin(seq_len, dim):
    inv_freq = 1.0 / (10000.0 ** (jnp.arange(0, dim, 2, dtype=jnp.float32) / dim))
    t = jnp.arange(seq_len, dtype=jnp.float32)
    freqs = jnp.outer(t, inv_freq)
    emb = jnp.concatenate([freqs, freqs], axis=-1)
    return jnp.cos(emb), jnp.sin(emb)


def rotate_half(x):
    half = x.shape[-1] // 2
    return jnp.concatenate([-x[..., half:], x[..., :half]], axis=-1)


def apply_rope(q, k, cos, sin):
    cos = cos[None, None]
    sin = sin[None, None]
    return q * cos + rotate_half(q) * sin, k * cos + rotate_half(k) * sin


def prepare_weights(wq, wk, wv, wo):
    """One-time (load-time) prep: fuse q/k/v, pre-transpose, cast to bf16."""
    w_qkv = jnp.concatenate([wq, wk, wv], axis=0).T.astype(jnp.bfloat16)
    w_o = wo.T.astype(jnp.bfloat16)
    return w_qkv, w_o


def llama_attention_heavy_hitter_forward(hidden_states, w_qkv, w_o, num_heads,
                                         heavy_ratio, *, tq=None):
    B, S, hidden = hidden_states.shape
    D = hidden // num_heads

    # Fused q/k/v projection: x is read from HBM once; bf16 MXU operands.
    x2d = hidden_states.reshape(B * S, hidden).astype(jnp.bfloat16)
    qkv = pallas_matmul(x2d, w_qkv, out_dtype=jnp.float32)   # (B*S, 3*hidden)

    def split_heads(y):
        return y.reshape(B, S, num_heads, D).transpose(0, 2, 1, 3)

    q = split_heads(qkv[:, :hidden])
    k = split_heads(qkv[:, hidden:2 * hidden])
    v = split_heads(qkv[:, 2 * hidden:])

    # TODO(synk): rotary embedding + head reshapes kept as plain JAX glue.
    cos, sin = rotary_cos_sin(S, D)
    q, k = apply_rope(q, k, cos, sin)

    # Fold 1/sqrt(D) into q (f32), then bf16 feed for the MXU.
    q = (q * (1.0 / math.sqrt(D))).astype(jnp.bfloat16)
    k = k.astype(jnp.bfloat16)
    v = v.astype(jnp.bfloat16)

    heavy_budget = int(heavy_ratio * S)
    if heavy_budget < 1:
        # TODO(synk): heavy_budget == 0 degenerate PyTorch behaviour (all rows
        # past row 0 fully masked to min) is not reproduced; clamp to 1.
        heavy_budget = 1

    attn_out = pallas_heavy_hitter_attention(q, k, v, heavy_budget, tq=tq)

    if attn_out.ndim == 3:                 # direct (B, S, hidden) bf16 layout
        out2d = attn_out.reshape(B * S, hidden)
    else:                                  # (B, H, S, D) fallback layout
        out2d = attn_out.transpose(0, 2, 1, 3).reshape(B * S, hidden)
    out = pallas_matmul(out2d, w_o,
                        out_dtype=hidden_states.dtype).reshape(B, S, hidden)
    return out, (q, k, v, heavy_budget, attn_out)


# ----------------------------------------------------------------------------
# Pure-JAX reference for the attention core (correctness check)
# ----------------------------------------------------------------------------
def reference_attention(q, k, v, heavy_budget):
    """Consumes the same (already 1/sqrt(D)-scaled) bf16 q/k/v as the kernel."""
    B, H, S, D = q.shape
    f32_min = jnp.float32(jnp.finfo(jnp.float32).min)
    scores = jnp.einsum("bhqd,bhkd->bhqk", q, k,
                        preferred_element_type=jnp.float32)
    row = jnp.arange(S)[:, None]
    col = jnp.arange(S)[None, :]
    causal = (col <= row)[None, None]
    scores = jnp.where(causal, scores, f32_min)

    # torch.topk(softmax(row)) selects the same indices as top-k of the raw
    # scores (softmax is monotone), so select on scores directly.
    _, idx = jax.lax.top_k(scores, heavy_budget)                   # (B,H,S,k)
    topk_mask = jnp.sum(jax.nn.one_hot(idx, S, dtype=jnp.float32), axis=-2) > 0

    mask_bottom = jnp.where((row <= heavy_budget)[None, None], causal, topk_mask)
    masked = jnp.where(mask_bottom, scores, f32_min)
    p = jax.nn.softmax(masked, axis=-1)
    return jnp.einsum("bhqk,bhkd->bhqd", p.astype(v.dtype), v,
                      preferred_element_type=jnp.float32)


# ----------------------------------------------------------------------------
if __name__ == "__main__":
    def run_case(B, S, HIDDEN, NUM_HEADS, HEAVY_RATIO, tq=None, seed=0):
        key = jax.random.PRNGKey(seed)
        kq, kk_, kv_, ko, kx = jax.random.split(key, 5)
        # torch nn.Linear weights are (out_features, in_features)
        wq = 0.02 * jax.random.normal(kq, (HIDDEN, HIDDEN), jnp.float32)
        wk = 0.02 * jax.random.normal(kk_, (HIDDEN, HIDDEN), jnp.float32)
        wv = 0.02 * jax.random.normal(kv_, (HIDDEN, HIDDEN), jnp.float32)
        wo = 0.02 * jax.random.normal(ko, (HIDDEN, HIDDEN), jnp.float32)
        hidden_states = jax.random.normal(kx, (B, S, HIDDEN), jnp.float32)

        w_qkv, w_o = prepare_weights(wq, wk, wv, wo)
        out, (q, k, v, hb, attn_out) = llama_attention_heavy_hitter_forward(
            hidden_states, w_qkv, w_o, NUM_HEADS, HEAVY_RATIO, tq=tq)
        out = jax.block_until_ready(out)

        # Validate the Pallas attention core against a pure-JAX reference that
        # consumes the same bf16 q/k/v (tolerance covers the approx reciprocal
        # plus the bf16 rounding of the probabilities and the output).
        ref = reference_attention(q, k, v, hb)                    # (B,H,S,D)
        if attn_out.ndim == 3:
            ref = ref.transpose(0, 2, 1, 3).reshape(attn_out.shape)
        np.testing.assert_allclose(np.asarray(attn_out, dtype=np.float32),
                                   np.asarray(ref, dtype=np.float32),
                                   rtol=2e-2, atol=3e-3)
        assert out.shape == (B, S, HIDDEN)
        assert np.isfinite(np.asarray(out)).all()

    # Small config consistent with the module: hidden=32, heads=4, head_dim=8
    # (exercises the (B,H,S,D) fallback output layout).
    run_case(B=2, S=16, HIDDEN=32, NUM_HEADS=4, HEAVY_RATIO=0.5)

    # head_dim=128 config: exercises the lane-dense direct (B,S,hidden) bf16
    # output path, multi-tile q axis, and the conditional lower-16 refinement.
    run_case(B=1, S=256, HIDDEN=256, NUM_HEADS=2, HEAVY_RATIO=0.25, tq=128,
             seed=1)

    print("KERNEL_OK")
</pallas_src>

<mosaic_0001>
module attributes {stable_mosaic.version = 11 : i64} {
  func.func @_matmul_kernel(%arg0: i32, %arg1: i32, %arg2: i32, %arg3: memref<32x32xbf16, #tpu.memory_space<vmem>>, %arg4: memref<32x96xbf16, #tpu.memory_space<vmem>>, %arg5: memref<32x96xf32, #tpu.memory_space<vmem>>, %arg6: memref<32x96xf32, #tpu.memory_space<vmem>>) attributes {dimension_semantics = [#tpu.dimension_semantics<parallel>, #tpu.dimension_semantics<parallel>, #tpu.dimension_semantics<arbitrary>], iteration_bounds = array<i64: 1, 1, 1>, scalar_prefetch = 0 : i64, scratch_operands = 1 : i64, tpu.core_type = #tpu.core_type<tc>, window_params = [{transform_indices = @transform_0, window_bounds = array<i64: 32, 32>}, {transform_indices = @transform_1, window_bounds = array<i64: 32, 96>}, {transform_indices = @transform_2, window_bounds = array<i64: 32, 96>}]} {
    %c0_i32 = arith.constant 0 : i32
    %0 = arith.cmpi eq, %arg2, %c0_i32 : i32
    %1 = arith.extui %0 : i1 to i32
    %c0_i32_0 = arith.constant 0 : i32
    %2 = arith.cmpi ne, %1, %c0_i32_0 : i32
    scf.if %2 {
      %cst_10 = arith.constant 0.000000e+00 : f32
      %12 = vector.broadcast %cst_10 : f32 to vector<32x96xf32>
      %c0_11 = arith.constant 0 : index
      %c0_12 = arith.constant 0 : index
      %13 = vector.load %arg6[%c0_11, %c0_12] : memref<32x96xf32, #tpu.memory_space<vmem>>, vector<32x96xf32>
      tpu.vector_store %arg6[%c0_11, %c0_12], %12 {strides = array<i32>} : memref<32x96xf32, #tpu.memory_space<vmem>>, vector<32x96xf32>,
    } else {
    }
    %c0 = arith.constant 0 : index
    %c0_1 = arith.constant 0 : index
    %3 = vector.load %arg6[%c0, %c0_1] : memref<32x96xf32, #tpu.memory_space<vmem>>, vector<32x96xf32>
    %c0_2 = arith.constant 0 : index
    %c0_3 = arith.constant 0 : index
    %4 = vector.load %arg3[%c0_2, %c0_3] : memref<32x32xbf16, #tpu.memory_space<vmem>>, vector<32x32xbf16>
    %c0_4 = arith.constant 0 : index
    %c0_5 = arith.constant 0 : index
    %5 = vector.load %arg4[%c0_4, %c0_5] : memref<32x96xbf16, #tpu.memory_space<vmem>>, vector<32x96xbf16>
    %cst = arith.constant dense<0.000000e+00> : vector<32x96xf32>
    %6 = tpu.matmul %4, %5, %cst {dimension_numbers = #tpu.dot_dimension_numbers<[1], [0], [0], [1], [0, 0, 1, 1], [], []>} : vector<32x32xbf16>, vector<32x96xbf16>, vector<32x96xf32> -> vector<32x96xf32>
    %7 = arith.addf %3, %6 : vector<32x96xf32>
    %c0_6 = arith.constant 0 : index
    %c0_7 = arith.constant 0 : index
    %8 = vector.load %arg6[%c0_6, %c0_7] : memref<32x96xf32, #tpu.memory_space<vmem>>, vector<32x96xf32>
    tpu.vector_store %arg6[%c0_6, %c0_7], %7 {strides = array<i32>} : memref<32x96xf32, #tpu.memory_space<vmem>>, vector<32x96xf32>,
    %c0_i32_8 = arith.constant 0 : i32
    %9 = arith.cmpi eq, %arg2, %c0_i32_8 : i32
    %10 = arith.extui %9 : i1 to i32
    %c0_i32_9 = arith.constant 0 : i32
    %11 = arith.cmpi ne, %10, %c0_i32_9 : i32
    scf.if %11 {
      %c0_10 = arith.constant 0 : index
      %c0_11 = arith.constant 0 : index
      %12 = vector.load %arg6[%c0_10, %c0_11] : memref<32x96xf32, #tpu.memory_space<vmem>>, vector<32x96xf32>
      %c0_12 = arith.constant 0 : index
      %c0_13 = arith.constant 0 : index
      %13 = vector.load %arg5[%c0_12, %c0_13] : memref<32x96xf32, #tpu.memory_space<vmem>>, vector<32x96xf32>
      tpu.vector_store %arg5[%c0_12, %c0_13], %12 {strides = array<i32>} : memref<32x96xf32, #tpu.memory_space<vmem>>, vector<32x96xf32>,
    } else {
    }
    return
  }
  func.func @transform_0(%arg0: i32, %arg1: i32, %arg2: i32) -> (i32, i32) {
    %c0_i32 = arith.constant 0 : i32
    return %arg0, %arg2 : i32, i32
  }
  func.func @transform_1(%arg0: i32, %arg1: i32, %arg2: i32) -> (i32, i32) {
    %c0_i32 = arith.constant 0 : i32
    return %arg2, %arg1 : i32, i32
  }
  func.func @transform_2(%arg0: i32, %arg1: i32, %arg2: i32) -> (i32, i32) {
    %c0_i32 = arith.constant 0 : i32
    return %arg0, %arg1 : i32, i32
  }
}

</mosaic_0001>

<bundles_post_ra>
// kernel: tpu_custom_call.1
= control target key start
LH: loop header
LB: loop body
LE: loop exit
PB: predicated region body
PF: predicated region fallthrough
CT: control target
= control target key end

     0   :  { %7 = vsyncpa [#allocation4], 0  ;;  %s351_s0 = inlined_call_operand.hbm [shape: bf16[32,32], index: 0, kind: input, shape index: {}]   ;;  %s352_s1 = inlined_call_operand.hbm [shape: bf16[32,96], index: 1, kind: input, shape index: {}]   ;;  %s353_s2 = inlined_call_operand.hbm [shape: f32[32,96], index: 2, kind: output, shape index: {}]  }
   0x1   :  { %8 = vsyncpa [#allocation7], 0 }
   0x2   :  { %9 = vsyncpa [#allocation5], 0  ;;  %s280_s9 = smov [#allocation3]   ;;  %s208_s13 = scalar_lea.hbm %s351_s0, 256 }
   0x3   :  { %s15_s10 = sshll.u32 %s280_s9, 4  ;;  %p209_p0 = scmp.ne.s32.totalorder %s351_s0, %s208_s13  ;;  %s16_s10 = int_to_ptr.vmem [resolvable:$true] %s15_s10 }
   0x4   :  { %p212_p1 = scmp.lt.u32.totalorder %s208_s13, %s351_s0 }
   0x6   :  { %p214_p2 = pnand %p212_p1, %p209_p0 }
   0x8   :  { %217 = shalt.err (!%p214_p2)
}
   0x9   :  { %s218_s18 = scalar_lea.vmem %s16_s10, 256  ;;  %p223_p4 = scmp.lt.s32.totalorder %s16_s10, %s16_s10 }
   0xa   :  { %p219_p3 = scmp.ne.s32.totalorder %s16_s10, %s218_s18  ;;  %p224_p5 = scmp.lt.s32.totalorder %s218_s18, %s218_s18 }
   0xc   :  { %p225_p6 = por %p224_p5, %p223_p4 }
   0xe   :  { %p226_p7 = pnand %p225_p6, %p219_p3 }
  0x10   :  { %229 = shalt.err (!%p226_p7)
}
  0x11   :  { %s281_s19 = smov 64   ;;  %s282_s20 = smov 4  }
  0x12   :  { %21 = dma.hbm_to_vmem [thread:$0]  %s351_s0, 256, %s16_s10, [#allocation4], %s281_s19, %s281_s19, %s282_s20  }
  0x13   :  { %s283_s23 = smov [#allocation6]   ;;  %s230_s27 = scalar_lea.hbm %s352_s1, 256 }
  0x14   :  { %s27_s24 = sshll.u32 %s283_s23, 4  ;;  %p231_p8 = scmp.ne.s32.totalorder %s352_s1, %s230_s27  ;;  %s28_s24 = int_to_ptr.vmem [resolvable:$true] %s27_s24 }
  0x15   :  { %p234_p9 = scmp.lt.u32.totalorder %s230_s27, %s352_s1 }
  0x17   :  { %p236_p10 = pnand %p234_p9, %p231_p8 }
  0x19   :  { %239 = shalt.err (!%p236_p10)
}
  0x1a   :  { %s240_s4 = scalar_lea.vmem %s28_s24, 256  ;;  %p245_p12 = scmp.lt.s32.totalorder %s28_s24, %s28_s24 }
  0x1b   :  { %p241_p11 = scmp.ne.s32.totalorder %s28_s24, %s240_s4  ;;  %p246_p13 = scmp.lt.s32.totalorder %s240_s4, %s240_s4 }
  0x1d   :  { %p247_p0 = por %p246_p13, %p245_p12 }
  0x1f   :  { %p248_p1 = pnand %p247_p0, %p241_p11 }
  0x21   :  { %251 = shalt.err (!%p248_p1)
}
  0x22   :  { %33 = dma.hbm_to_vmem [thread:$0]  %s352_s1, 256, %s28_s24, [#allocation7], %s281_s19, %s281_s19, %s282_s20  }
  0x23   :  { %274 = dma.done.wait [#allocation4], 256  }
  0x24   :  { %275 = vsyncadd [#allocation4], 4294967040 }
  0x25   :  { %276 = dma.done.wait [#allocation7], 256  }
  0x26   :  { %277 = vsyncadd [#allocation7], 4294967040  ;;  %vm45_vm0 = vcmask 785408   ;;  %v284_v0 = vmov 0.0   ;;  %v204_v1 = vld [vmem:[#allocation6] sm:$0xff]   ;;  %v205_v2 = vld [vmem:[#allocation6 + $0x8] sm:$0xff]  }
  0x27   :  { %48 = vst.msk [vmem:[#allocation2 + $0x10] sm:$0xff] %vm45_vm0, %v284_v0  ;;  %46 = vst.msk [vmem:[#allocation2] sm:$0xff] %vm45_vm0, %v284_v0  ;;  %vm84_vm1 = vcmask 261120   ;;  %188 = vmatprep.subr.bf16.mxu0 %v204_v1  ;;  %v206_v3 = vld [vmem:[#allocation3] sm:$0xff]   ;;  %v207_v4 = vld [vmem:[#allocation3 + $0x8] sm:$0xff]   ;;  %s285_s1 = smov [#allocation8]  }
  0x28   :  { %47 = vst.msk [vmem:[#allocation2 + $0x8] sm:$0xff] %vm45_vm0, %v284_v0  ;;  %49 = vst.msk [vmem:[#allocation2 + $0x18] sm:$0xff] %vm45_vm0, %v284_v0  ;;  %189 = vmatpush3.bf16.msra.mxu0 %v204_v1  ;;  %192 = vmatprep.mubr.msk.bf16.mxu0 %vm84_vm1, %v206_v3  ;;  %s165_s6 = sshll.u32 %s285_s1, 4  ;;  %s166_s6 = int_to_ptr.vmem [resolvable:$true] %s165_s6 }
  0x29   :  { %190 = vmatprep.subr.bf16.mxu0 %v205_v2  ;;  %s252_s7 = scalar_lea.vmem %s166_s6, 512  ;;  %p257_p3 = scmp.lt.s32.totalorder %s166_s6, %s166_s6 }
  0x2a   :  { %p253_p2 = scmp.ne.s32.totalorder %s166_s6, %s252_s7  ;;  %p258_p4 = scmp.lt.s32.totalorder %s252_s7, %s252_s7 }
  0x2c   :  { %191 = vmatpush3.bf16.msra.mxu0 %v205_v2  ;;  %p259_p5 = por %p258_p4, %p257_p3 }
  0x2e   :  { %v52_v5 = vld [vmem:[#allocation2 + $0x10] sm:$0xff]  ;;  %v50_v6 = vld [vmem:[#allocation2] sm:$0xff]  ;;  %p260_p6 = pnand %p259_p5, %p253_p2 }
  0x2f   :  { %193 = vmatmul.mubr.msk.bf16.vlgmr.msra.gmra.mrb[0].mxu0 %vm84_vm1, %v207_v4  ;;  %v53_v8 = vld [vmem:[#allocation2 + $0x18] sm:$0xff]  ;;  %v51_v11 = vld [vmem:[#allocation2 + $0x8] sm:$0xff] }
 0x102   :  { %v194_v7 = vpop.f32.mrb[0].mxu0 }
 0x103   :  { %v142_v9 = vadd.f32 %v194_v7, %v52_v5  ;;  %v125_v10 = vpop.f32.mrb[1].mxu0 }
 0x104   :  { %v140_v12 = vadd.f32 %v125_v10, %v50_v6  ;;  %v195_v13 = vpop.f32.mrb[2].mxu0 }
 0x105   :  { %147 = vst.msk [vmem:[#allocation2 + $0x10] sm:$0xff] %vm45_vm0, %v142_v9  ;;  %v143_v14 = vadd.f32 %v195_v13, %v53_v8  ;;  %v128_v15 = vpop.f32.mrb[3].mxu0 }
 0x106   :  { %145 = vst.msk [vmem:[#allocation2] sm:$0xff] %vm45_vm0, %v140_v12  ;;  %v141_v16 = vadd.f32 %v128_v15, %v51_v11 }
 0x107   :  { %148 = vst.msk [vmem:[#allocation2 + $0x18] sm:$0xff] %vm45_vm0, %v143_v14 }
 0x108   :  { %146 = vst.msk [vmem:[#allocation2 + $0x8] sm:$0xff] %vm45_vm0, %v141_v16 }
 0x10c   :  { %v154_v17 = vld [vmem:[#allocation2 + $0x10] sm:$0xff] }
 0x10d   :  { %v152_v18 = vld [vmem:[#allocation2] sm:$0xff]  ;;  %158 = vst.msk [vmem:[#allocation8 + $0x10] sm:$0xff] %vm45_vm0, %v154_v17 }
 0x10e   :  { %v155_v19 = vld [vmem:[#allocation2 + $0x18] sm:$0xff]  ;;  %156 = vst.msk [vmem:[#allocation8] sm:$0xff] %vm45_vm0, %v152_v18 }
 0x10f   :  { %v153_v20 = vld [vmem:[#allocation2 + $0x8] sm:$0xff]  ;;  %159 = vst.msk [vmem:[#allocation8 + $0x18] sm:$0xff] %vm45_vm0, %v155_v19 }
 0x110   :  { %157 = vst.msk [vmem:[#allocation8 + $0x8] sm:$0xff] %vm45_vm0, %v153_v20 }
 0x111   :  { %263 = shalt.err (!%p260_p6)
}
 0x112   :  { %s264_s10 = scalar_lea.hbm %s353_s2, 512 }
 0x113   :  { %p265_p7 = scmp.ne.s32.totalorder %s353_s2, %s264_s10  ;;  %p268_p8 = scmp.lt.u32.totalorder %s264_s10, %s353_s2 }
 0x115   :  { %p270_p9 = pnand %p268_p8, %p265_p7 }
 0x117   :  { %273 = shalt.err (!%p270_p9)
}
 0x118   :  { %s286_s15 = smov 128   ;;  %s287_s16 = smov 8  }
 0x119   :  { %171 = dma.vmem_to_hbm [thread:$0]  %s166_s6, 512, %s353_s2, [#allocation5], %s286_s15, %s286_s15, %s287_s16  }
 0x11a   :  { %278 = dma.done.wait [#allocation5], 512  }
 0x11b   :  { %279 = vsyncadd [#allocation5], 4294966784 }
 0x11c   :  { %175 = vsyncpa [#allocation4], 1 }
 0x11d   :  { %176 = vsyncpa [#allocation7], 1 }
 0x11e   :  { %177 = vsyncpa [#allocation5], 1 }

</bundles_post_ra>
